<compile_context>
chip_gen: v7x
topology: tpu7x:2x2x1
jax: 0.10.0
libtpu: 0.0.40
codegen_flags: <defaults>
</compile_context>

<pallas_src>
import functools

import jax
import jax.numpy as jnp
from jax.experimental import pallas as pl
from jax.experimental.pallas import tpu as pltpu


def _round_up(n, m):
    return ((n + m - 1) // m) * m


def make_rnn_fc_kernel(T, Bp):
    """Builds the kernel with T (timesteps) and Bp (padded batch) baked in."""

    def rnn_fc_kernel(x_ref,     # (T*Bp, Ip)  bf16, time-major, zero-padded
                      wih_ref,   # (Ip, Hp)    bf16  = W_ih^T (zero-padded)
                      whh_ref,   # (Hp, Hp)    bf16  = W_hh^T (zero-padded)
                      bias_ref,  # (1, Hp)     f32   = b_ih + b_hh (zero-padded)
                      wfc_ref,   # (Hp, Op)    bf16  = W_fc^T (zero-padded)
                      bfc_ref,   # (1, Op)     f32   = b_fc (zero-padded)
                      out_ref):  # (Bp, Op)    f32
        Hp = whh_ref.shape[0]

        # Hoisted input projection: one (T*Bp, Ip) @ (Ip, Hp) bf16 MXU matmul
        # for all timesteps, f32 accumulation, bias added once outside the
        # serial recurrence.
        xw = (jnp.dot(x_ref[...], wih_ref[...],
                      preferred_element_type=jnp.float32)
              + bias_ref[...])                      # (T*Bp, Hp) f32

        whh = whh_ref[...]                          # bf16, resident (8 vregs)
        h = jnp.zeros((Bp, Hp), jnp.float32)        # h_0 = 0, vreg-resident

        # Serial Elman recurrence, fully unrolled (T is compile-time constant).
        # Per step: one small bf16 matmul (f32 acc) + f32 add + f32 tanh.
        # Slices of xw are static and (8,128)-tile-aligned (Bp % 8 == 0).
        for t in range(T):
            h_pre = xw[t * Bp:(t + 1) * Bp, :] + jnp.dot(
                h.astype(jnp.bfloat16), whh,
                preferred_element_type=jnp.float32)
            h = jnp.tanh(h_pre)                     # f32 EUP path

        # Fused final linear layer on the last hidden state (lane-dense out).
        out_ref[...] = (jnp.dot(h.astype(jnp.bfloat16), wfc_ref[...],
                                preferred_element_type=jnp.float32)
                        + bfc_ref[...]).astype(out_ref.dtype)

    return rnn_fc_kernel


def prepare_params(params):
    """One-time weight prep (padding / transposition / dtype cast).

    Runs ONCE at init, not per forward call — padded, transposed, bf16-cast
    weights are what the kernel consumes directly.
    """
    w_ih, w_hh, b_ih, b_hh, w_fc, b_fc = (
        params["w_ih"], params["w_hh"], params["b_ih"],
        params["b_hh"], params["w_fc"], params["b_fc"])

    H, I = w_ih.shape
    O = w_fc.shape[0]

    Ip = _round_up(I, 8)      # contraction dim: sublane-minimum padding only
    Hp = _round_up(H, 128)    # lane-dense hidden dim
    Op = _round_up(O, 128)    # lane-dense output dim

    bf16, f32 = jnp.bfloat16, jnp.float32
    wih_t = jnp.zeros((Ip, Hp), bf16).at[:I, :H].set(w_ih.T.astype(bf16))
    whh_t = jnp.zeros((Hp, Hp), bf16).at[:H, :H].set(w_hh.T.astype(bf16))
    bias = jnp.zeros((1, Hp), f32).at[0, :H].set((b_ih + b_hh).astype(f32))
    wfc_t = jnp.zeros((Hp, Op), bf16).at[:H, :O].set(w_fc.T.astype(bf16))
    bfc = jnp.zeros((1, Op), f32).at[0, :O].set(b_fc.astype(f32))

    return {"wih_t": wih_t, "whh_t": whh_t, "bias": bias,
            "wfc_t": wfc_t, "bfc": bfc}


@functools.partial(jax.jit, static_argnames=("output_size",))
def simple_rnn_forward(x, prep, *, output_size):
    """x: (B, T, input_size) float32, batch-first (matches PyTorch forward)."""
    B, T, I = x.shape
    Ip, Hp = prep["wih_t"].shape
    Op = prep["wfc_t"].shape[1]
    Bp = _round_up(B, 8)

    # Batch-first -> time-major transpose fused with zero-padding + bf16 cast
    # in one pass, then flattened to (T*Bp, Ip) so the kernel needs no reshape.
    x_tm = jnp.zeros((T, Bp, Ip), jnp.bfloat16).at[:, :B, :I].set(
        jnp.transpose(x, (1, 0, 2)).astype(jnp.bfloat16))
    x_flat = x_tm.reshape(T * Bp, Ip)

    vmem = pl.BlockSpec(memory_space=pltpu.MemorySpace.VMEM)
    out_padded = pl.pallas_call(
        make_rnn_fc_kernel(T, Bp),
        out_shape=jax.ShapeDtypeStruct((Bp, Op), jnp.float32),
        in_specs=[vmem] * 6,
        out_specs=vmem,
    )(x_flat, prep["wih_t"], prep["whh_t"], prep["bias"],
      prep["wfc_t"], prep["bfc"])

    # Padded batch rows carry tanh(bias)-garbage by construction; they are
    # inert because only the real (B, O) slice is returned.
    return out_padded[:B, :output_size]


def init_params(key, input_size, hidden_size, output_size):
    """Deterministic init mirroring PyTorch default uniform ranges."""
    ks = jax.random.split(key, 6)
    rnn_bound = 1.0 / jnp.sqrt(hidden_size)
    fc_bound = 1.0 / jnp.sqrt(hidden_size)
    u = lambda k, shape, b: jax.random.uniform(k, shape, jnp.float32, -b, b)
    return {
        "w_ih": u(ks[0], (hidden_size, input_size), rnn_bound),
        "w_hh": u(ks[1], (hidden_size, hidden_size), rnn_bound),
        "b_ih": u(ks[2], (hidden_size,), rnn_bound),
        "b_hh": u(ks[3], (hidden_size,), rnn_bound),
        "w_fc": u(ks[4], (output_size, hidden_size), fc_bound),
        "b_fc": u(ks[5], (output_size,), fc_bound),
    }


def reference_forward(x, params):
    """Pure-JAX f32 reference (same math, for a sanity check)."""
    B, T, I = x.shape
    H = params["w_ih"].shape[0]
    h = jnp.zeros((B, H), jnp.float32)
    for t in range(T):
        h = jnp.tanh(x[:, t, :] @ params["w_ih"].T + params["b_ih"]
                     + h @ params["w_hh"].T + params["b_hh"])
    return h @ params["w_fc"].T + params["b_fc"]


if __name__ == "__main__":
    input_size = 5
    hidden_size = 32
    output_size = 2
    batch = 2
    seq_len = 8

    key = jax.random.PRNGKey(0)
    k_x, k_p = jax.random.split(key)
    x = jax.random.normal(k_x, (batch, seq_len, input_size), jnp.float32)
    params = init_params(k_p, input_size, hidden_size, output_size)

    # One-time weight prep: hoisted out of the per-call forward path.
    prep = prepare_params(params)
    prep = jax.tree_util.tree_map(jax.block_until_ready, prep)

    out = simple_rnn_forward(x, prep, output_size=output_size)
    out = jax.block_until_ready(out)

    ref = reference_forward(x, params)
    assert out.shape == (batch, output_size), out.shape
    # bf16 MXU operands (f32 accumulation) -> loosened tolerance vs f32 ref.
    assert jnp.allclose(out, ref, atol=2e-2, rtol=2e-2), (out, ref)

    print("KERNEL_OK")
</pallas_src>

<mosaic_0001>
module attributes {stable_mosaic.version = 11 : i64} {
  func.func @rnn_fc_kernel(%arg0: memref<64x8xbf16, #tpu.memory_space<vmem>>, %arg1: memref<8x128xbf16, #tpu.memory_space<vmem>>, %arg2: memref<128x128xbf16, #tpu.memory_space<vmem>>, %arg3: memref<1x128xf32, #tpu.memory_space<vmem>>, %arg4: memref<128x128xbf16, #tpu.memory_space<vmem>>, %arg5: memref<1x128xf32, #tpu.memory_space<vmem>>, %arg6: memref<8x128xf32, #tpu.memory_space<vmem>>) attributes {dimension_semantics = [], scalar_prefetch = 0 : i64, scratch_operands = 0 : i64, tpu.core_type = #tpu.core_type<tc>} {
    %c0 = arith.constant 0 : index
    %c0_0 = arith.constant 0 : index
    %0 = vector.load %arg0[%c0, %c0_0] : memref<64x8xbf16, #tpu.memory_space<vmem>>, vector<64x8xbf16>
    %c0_1 = arith.constant 0 : index
    %c0_2 = arith.constant 0 : index
    %1 = vector.load %arg1[%c0_1, %c0_2] : memref<8x128xbf16, #tpu.memory_space<vmem>>, vector<8x128xbf16>
    %cst = arith.constant dense<0.000000e+00> : vector<64x128xf32>
    %2 = tpu.matmul %0, %1, %cst {dimension_numbers = #tpu.dot_dimension_numbers<[1], [0], [0], [1], [0, 0, 1, 1], [], []>} : vector<64x8xbf16>, vector<8x128xbf16>, vector<64x128xf32> -> vector<64x128xf32>
    %c0_3 = arith.constant 0 : index
    %c0_4 = arith.constant 0 : index
    %3 = vector.load %arg3[%c0_3, %c0_4] : memref<1x128xf32, #tpu.memory_space<vmem>>, vector<1x128xf32>
    %4 = vector.broadcast %3 : vector<1x128xf32> to vector<64x128xf32>
    %5 = arith.addf %2, %4 : vector<64x128xf32>
    %c0_5 = arith.constant 0 : index
    %c0_6 = arith.constant 0 : index
    %6 = vector.load %arg2[%c0_5, %c0_6] : memref<128x128xbf16, #tpu.memory_space<vmem>>, vector<128x128xbf16>
    %cst_7 = arith.constant 0.000000e+00 : f32
    %7 = vector.broadcast %cst_7 : f32 to vector<8x128xf32>
    %8 = vector.extract_strided_slice %5 {offsets = [0, 0], sizes = [8, 128], strides = [1, 1]} : vector<64x128xf32> to vector<8x128xf32>
    %9 = arith.truncf %7 : vector<8x128xf32> to vector<8x128xbf16>
    %cst_8 = arith.constant dense<0.000000e+00> : vector<8x128xf32>
    %10 = tpu.matmul %9, %6, %cst_8 {dimension_numbers = #tpu.dot_dimension_numbers<[1], [0], [0], [1], [0, 0, 1, 1], [], []>} : vector<8x128xbf16>, vector<128x128xbf16>, vector<8x128xf32> -> vector<8x128xf32>
    %11 = arith.addf %8, %10 : vector<8x128xf32>
    %12 = math.tanh %11 : vector<8x128xf32>
    %13 = vector.extract_strided_slice %5 {offsets = [8, 0], sizes = [8, 128], strides = [1, 1]} : vector<64x128xf32> to vector<8x128xf32>
    %14 = arith.truncf %12 : vector<8x128xf32> to vector<8x128xbf16>
    %cst_9 = arith.constant dense<0.000000e+00> : vector<8x128xf32>
    %15 = tpu.matmul %14, %6, %cst_9 {dimension_numbers = #tpu.dot_dimension_numbers<[1], [0], [0], [1], [0, 0, 1, 1], [], []>} : vector<8x128xbf16>, vector<128x128xbf16>, vector<8x128xf32> -> vector<8x128xf32>
    %16 = arith.addf %13, %15 : vector<8x128xf32>
    %17 = math.tanh %16 : vector<8x128xf32>
    %18 = vector.extract_strided_slice %5 {offsets = [16, 0], sizes = [8, 128], strides = [1, 1]} : vector<64x128xf32> to vector<8x128xf32>
    %19 = arith.truncf %17 : vector<8x128xf32> to vector<8x128xbf16>
    %cst_10 = arith.constant dense<0.000000e+00> : vector<8x128xf32>
    %20 = tpu.matmul %19, %6, %cst_10 {dimension_numbers = #tpu.dot_dimension_numbers<[1], [0], [0], [1], [0, 0, 1, 1], [], []>} : vector<8x128xbf16>, vector<128x128xbf16>, vector<8x128xf32> -> vector<8x128xf32>
    %21 = arith.addf %18, %20 : vector<8x128xf32>
    %22 = math.tanh %21 : vector<8x128xf32>
    %23 = vector.extract_strided_slice %5 {offsets = [24, 0], sizes = [8, 128], strides = [1, 1]} : vector<64x128xf32> to vector<8x128xf32>
    %24 = arith.truncf %22 : vector<8x128xf32> to vector<8x128xbf16>
    %cst_11 = arith.constant dense<0.000000e+00> : vector<8x128xf32>
    %25 = tpu.matmul %24, %6, %cst_11 {dimension_numbers = #tpu.dot_dimension_numbers<[1], [0], [0], [1], [0, 0, 1, 1], [], []>} : vector<8x128xbf16>, vector<128x128xbf16>, vector<8x128xf32> -> vector<8x128xf32>
    %26 = arith.addf %23, %25 : vector<8x128xf32>
    %27 = math.tanh %26 : vector<8x128xf32>
    %28 = vector.extract_strided_slice %5 {offsets = [32, 0], sizes = [8, 128], strides = [1, 1]} : vector<64x128xf32> to vector<8x128xf32>
    %29 = arith.truncf %27 : vector<8x128xf32> to vector<8x128xbf16>
    %cst_12 = arith.constant dense<0.000000e+00> : vector<8x128xf32>
    %30 = tpu.matmul %29, %6, %cst_12 {dimension_numbers = #tpu.dot_dimension_numbers<[1], [0], [0], [1], [0, 0, 1, 1], [], []>} : vector<8x128xbf16>, vector<128x128xbf16>, vector<8x128xf32> -> vector<8x128xf32>
    %31 = arith.addf %28, %30 : vector<8x128xf32>
    %32 = math.tanh %31 : vector<8x128xf32>
    %33 = vector.extract_strided_slice %5 {offsets = [40, 0], sizes = [8, 128], strides = [1, 1]} : vector<64x128xf32> to vector<8x128xf32>
    %34 = arith.truncf %32 : vector<8x128xf32> to vector<8x128xbf16>
    %cst_13 = arith.constant dense<0.000000e+00> : vector<8x128xf32>
    %35 = tpu.matmul %34, %6, %cst_13 {dimension_numbers = #tpu.dot_dimension_numbers<[1], [0], [0], [1], [0, 0, 1, 1], [], []>} : vector<8x128xbf16>, vector<128x128xbf16>, vector<8x128xf32> -> vector<8x128xf32>
    %36 = arith.addf %33, %35 : vector<8x128xf32>
    %37 = math.tanh %36 : vector<8x128xf32>
    %38 = vector.extract_strided_slice %5 {offsets = [48, 0], sizes = [8, 128], strides = [1, 1]} : vector<64x128xf32> to vector<8x128xf32>
    %39 = arith.truncf %37 : vector<8x128xf32> to vector<8x128xbf16>
    %cst_14 = arith.constant dense<0.000000e+00> : vector<8x128xf32>
    %40 = tpu.matmul %39, %6, %cst_14 {dimension_numbers = #tpu.dot_dimension_numbers<[1], [0], [0], [1], [0, 0, 1, 1], [], []>} : vector<8x128xbf16>, vector<128x128xbf16>, vector<8x128xf32> -> vector<8x128xf32>
    %41 = arith.addf %38, %40 : vector<8x128xf32>
    %42 = math.tanh %41 : vector<8x128xf32>
    %43 = vector.extract_strided_slice %5 {offsets = [56, 0], sizes = [8, 128], strides = [1, 1]} : vector<64x128xf32> to vector<8x128xf32>
    %44 = arith.truncf %42 : vector<8x128xf32> to vector<8x128xbf16>
    %cst_15 = arith.constant dense<0.000000e+00> : vector<8x128xf32>
    %45 = tpu.matmul %44, %6, %cst_15 {dimension_numbers = #tpu.dot_dimension_numbers<[1], [0], [0], [1], [0, 0, 1, 1], [], []>} : vector<8x128xbf16>, vector<128x128xbf16>, vector<8x128xf32> -> vector<8x128xf32>
    %46 = arith.addf %43, %45 : vector<8x128xf32>
    %47 = math.tanh %46 : vector<8x128xf32>
    %48 = arith.truncf %47 : vector<8x128xf32> to vector<8x128xbf16>
    %c0_16 = arith.constant 0 : index
    %c0_17 = arith.constant 0 : index
    %49 = vector.load %arg4[%c0_16, %c0_17] : memref<128x128xbf16, #tpu.memory_space<vmem>>, vector<128x128xbf16>
    %cst_18 = arith.constant dense<0.000000e+00> : vector<8x128xf32>
    %50 = tpu.matmul %48, %49, %cst_18 {dimension_numbers = #tpu.dot_dimension_numbers<[1], [0], [0], [1], [0, 0, 1, 1], [], []>} : vector<8x128xbf16>, vector<128x128xbf16>, vector<8x128xf32> -> vector<8x128xf32>
    %c0_19 = arith.constant 0 : index
    %c0_20 = arith.constant 0 : index
    %51 = vector.load %arg5[%c0_19, %c0_20] : memref<1x128xf32, #tpu.memory_space<vmem>>, vector<1x128xf32>
    %52 = vector.broadcast %51 : vector<1x128xf32> to vector<8x128xf32>
    %53 = arith.addf %50, %52 : vector<8x128xf32>
    %c0_21 = arith.constant 0 : index
    %c0_22 = arith.constant 0 : index
    %54 = vector.load %arg6[%c0_21, %c0_22] : memref<8x128xf32, #tpu.memory_space<vmem>>, vector<8x128xf32>
    tpu.vector_store %arg6[%c0_21, %c0_22], %53 {strides = array<i32>} : memref<8x128xf32, #tpu.memory_space<vmem>>, vector<8x128xf32>,
    return
  }
}

</mosaic_0001>

<bundles_post_ra>
// kernel: simple_rnn_forward.1
= control target key start
LH: loop header
LB: loop body
LE: loop exit
PB: predicated region body
PF: predicated region fallthrough
CT: control target
= control target key end

     0   :  { %11 = vsyncpa [#allocation3], 0  ;;  %s1050_s21 = smov [#allocation2]   ;;  %s1353_s0 = inlined_call_operand.vmem [shape: bf16[64,8], index: 0, kind: input, shape index: {}]   ;;  %s1354_s1 = inlined_call_operand.vmem [shape: bf16[8,128], index: 1, kind: input, shape index: {}]   ;;  %s1355_s2 = inlined_call_operand.vmem [shape: bf16[128,128], index: 2, kind: input, shape index: {}]   ;;  %s1356_s3 = inlined_call_operand.vmem [shape: f32[1,128], index: 3, kind: input, shape index: {}]   ;;  %s1357_s4 = inlined_call_operand.hbm [shape: bf16[128,128], index: 4, kind: input, shape index: {}]   ;;  %s1358_s5 = inlined_call_operand.vmem [shape: f32[1,128], index: 5, kind: input, shape index: {}]   ;;  %s1359_s6 = inlined_call_operand.vmem [shape: f32[8,128], index: 6, kind: output, shape index: {}]  }
   0x1   :  { %s25_s22 = sshll.u32 %s1050_s21, 4  ;;  %s1026_s25 = scalar_lea.hbm %s1357_s4, 1024  ;;  %s26_s22 = int_to_ptr.vmem [resolvable:$true] %s25_s22 }
   0x2   :  { %p1027_p0 = scmp.ne.s32.totalorder %s1357_s4, %s1026_s25  ;;  %p1030_p1 = scmp.lt.u32.totalorder %s1026_s25, %s1357_s4 }
   0x4   :  { %p1032_p2 = pnand %p1030_p1, %p1027_p0 }
   0x6   :  { %1035 = shalt.err (!%p1032_p2)
}
   0x7   :  { %s1036_s30 = scalar_lea.vmem %s26_s22, 1024  ;;  %p1041_p4 = scmp.lt.s32.totalorder %s26_s22, %s26_s22 }
   0x8   :  { %p1037_p3 = scmp.ne.s32.totalorder %s26_s22, %s1036_s30  ;;  %p1042_p5 = scmp.lt.s32.totalorder %s1036_s30, %s1036_s30 }
   0xa   :  { %p1043_p6 = por %p1042_p5, %p1041_p4 }
   0xc   :  { %p1044_p7 = pnand %p1043_p6, %p1037_p3 }
   0xe   :  { %1047 = shalt.err (!%p1044_p7)
}
   0xf   :  { %s1051_s7 = smov 64   ;;  %s1052_s8 = smov 4  }
  0x10   :  { %31 = dma.hbm_to_vmem [thread:$0]  %s1357_s4, 1024, %s26_s22, [#allocation3], %s1051_s7, %s1051_s7, %s1052_s8  }
  0x11   :  { %1048 = dma.done.wait [#allocation3], 1024  }
  0x12   :  { %1049 = vsyncadd [#allocation3], 4294966272  ;;  %v1053_v0 = vmov 0.0   ;;  %vm1054_vm0 = vmmov 0   ;;  %v1109_v1 = vld [vmem:[%s1355_s2] sm:$0xff]   ;;  %v1115_v2 = vld [vmem:[%s1355_s2 + $0x8] sm:$0xff]  }
  0x13   :  { %803 = vmatprep.subr.bf16.mxu1 %v1053_v0  ;;  %819 = vmatprep.mubr.msk.bf16.mxu1 %vm1054_vm0, %v1053_v0  ;;  %vm87_vm1 = vcmask 1043456   ;;  %v1121_v3 = vld [vmem:[%s1355_s2 + $0x10] sm:$0xff]   ;;  %vm74_vm2 = vcmask 64512   ;;  %v46_v4 = vld [vmem:[%s1354_s1] sm:$0xf]  ;;  %v998_v7 = vld [vmem:[%s1353_s0 + $0x8] sm:$0xff]  }
  0x14   :  { %804 = vmatpush3.bf16.msra.mxu1 %v1109_v1  ;;  %983 = vmatprep.subr.msk.bf16.mxu0 %vm87_vm1, %v46_v4  ;;  %v89_v5 = vsel %vm87_vm1, %v46_v4, 0  ;;  %v996_v6 = vld [vmem:[%s1353_s0] sm:$0xff]   ;;  %v1140_v8 = vld [vmem:[%s1355_s2 + $0x18] sm:$0xff]   ;;  %v1159_v10 = vld [vmem:[%s1355_s2 + $0x28] sm:$0xff]   ;;  %v1055_v13 = vmov 0  }
  0x15   :  { %805 = vmatprep.subr.bf16.mxu1 %v1053_v0  ;;  %794 = vmatpush3.bf16.msra.mxu0 %v89_v5  ;;  %v1147_v9 = vld [vmem:[%s1355_s2 + $0x20] sm:$0xff]   ;;  %v1168_v11 = vld [vmem:[%s1355_s2 + $0x30] sm:$0xff]   ;;  %v1177_v12 = vld [vmem:[%s1355_s2 + $0x38] sm:$0xff]  }
  0x16   :  { %795 = vmatprep.mubr.msk.bf16.mxu0 %vm74_vm2, %v996_v6  ;;  %823 = vmatprep.subr.bf16.mxu0 %v1053_v0  ;;  %v1000_v14 = vld [vmem:[%s1353_s0 + $0x10] sm:$0xff]   ;;  %v1001_v15 = vld [vmem:[%s1353_s0 + $0x18] sm:$0xff]   ;;  %v1225_v20 = vld [vmem:[%s1356_s3] ss:$0 sm:$0xff] }
  0x18   :  { %806 = vmatpush3.bf16.msra.mxu1 %v1115_v2  ;;  %796 = vmatmul.mubr.msk.bf16.vlgmr.msra.gmra.mrb[0].mxu0 %vm74_vm2, %v998_v7 }
  0x19   :  { %807 = vmatprep.subr.bf16.mxu1 %v1053_v0  ;;  %824 = vmatpush3.bf16.msra.mxu0 %v1109_v1 }
  0x1a   :  { %825 = vmatprep.subr.bf16.mxu0 %v1053_v0  ;;  %799 = vmatprep.mubr.msk.bf16.mxu0 %vm74_vm2, %v1000_v14 }
  0x1c   :  { %808 = vmatpush3.bf16.msra.mxu1 %v1121_v3 }
  0x1d   :  { %809 = vmatprep.subr.bf16.mxu1 %v1053_v0  ;;  %826 = vmatpush3.bf16.msra.mxu0 %v1115_v2 }
  0x1e   :  { %827 = vmatprep.subr.bf16.mxu0 %v1053_v0 }
  0x20   :  { %810 = vmatpush3.bf16.msra.mxu1 %v1140_v8  ;;  %800 = vmatmul.mubr.msk.bf16.gmra.mrb[4].mxu0 %vm74_vm2, %v1001_v15 }
  0x21   :  { %811 = vmatprep.subr.bf16.mxu1 %v1053_v0  ;;  %828 = vmatpush3.bf16.msra.mxu0 %v1121_v3 }
  0x22   :  { %829 = vmatprep.subr.bf16.mxu0 %v1053_v0  ;;  %839 = vmatprep.mubr.msk.bf16.mxu0 %vm1054_vm0, %v1053_v0 }
  0x24   :  { %812 = vmatpush3.bf16.msra.mxu1 %v1147_v9 }
  0x25   :  { %813 = vmatprep.subr.bf16.mxu1 %v1053_v0  ;;  %830 = vmatpush3.bf16.msra.mxu0 %v1140_v8 }
  0x26   :  { %831 = vmatprep.subr.bf16.mxu0 %v1053_v0 }
  0x28   :  { %814 = vmatpush3.bf16.msra.mxu1 %v1159_v10 }
  0x29   :  { %815 = vmatprep.subr.bf16.mxu1 %v1053_v0  ;;  %832 = vmatpush3.bf16.msra.mxu0 %v1147_v9 }
  0x2a   :  { %833 = vmatprep.subr.bf16.mxu0 %v1053_v0 }
  0x2c   :  { %816 = vmatpush3.bf16.msra.mxu1 %v1168_v11 }
  0x2d   :  { %817 = vmatprep.subr.bf16.mxu1 %v1053_v0  ;;  %834 = vmatpush3.bf16.msra.mxu0 %v1159_v10 }
  0x2e   :  { %835 = vmatprep.subr.bf16.mxu0 %v1053_v0 }
  0x30   :  { %818 = vmatpush3.bf16.msra.mxu1 %v1177_v12 }
  0x31   :  { %843 = vmatprep.subr.bf16.mxu1 %v1053_v0  ;;  %836 = vmatpush3.bf16.msra.mxu0 %v1168_v11 }
  0x32   :  { %837 = vmatprep.subr.bf16.mxu0 %v1053_v0 }
  0x33   :  { %820 = vmatmul.mubr.bf16.vlgmr.msra.gmra.mrb[0].mxu1 %v1055_v13  ;;  %v1005_v13 = vld [vmem:[#allocation2 + $0x18] sm:$0xff]  }
  0x34   :  { %844 = vmatpush3.bf16.msra.mxu1 %v1109_v1  ;;  %859 = vmatprep.mubr.msk.bf16.mxu1 %vm1054_vm0, %v1053_v0 }
  0x35   :  { %845 = vmatprep.subr.bf16.mxu1 %v1053_v0  ;;  %838 = vmatpush3.bf16.msra.mxu0 %v1177_v12 }
  0x36   :  { %863 = vmatprep.subr.bf16.mxu0 %v1053_v0 }
  0x38   :  { %846 = vmatpush3.bf16.msra.mxu1 %v1115_v2 }
  0x39   :  { %847 = vmatprep.subr.bf16.mxu1 %v1053_v0 }
  0x3c   :  { %848 = vmatpush3.bf16.msra.mxu1 %v1121_v3 }
  0x3d   :  { %849 = vmatprep.subr.bf16.mxu1 %v1053_v0 }
  0x40   :  { %850 = vmatpush3.bf16.msra.mxu1 %v1140_v8 }
  0x41   :  { %851 = vmatprep.subr.bf16.mxu1 %v1053_v0 }
  0x44   :  { %852 = vmatpush3.bf16.msra.mxu1 %v1147_v9 }
  0x45   :  { %853 = vmatprep.subr.bf16.mxu1 %v1053_v0 }
  0x48   :  { %854 = vmatpush3.bf16.msra.mxu1 %v1159_v10 }
  0x49   :  { %855 = vmatprep.subr.bf16.mxu1 %v1053_v0 }
  0x4c   :  { %856 = vmatpush3.bf16.msra.mxu1 %v1168_v11 }
  0x4d   :  { %857 = vmatprep.subr.bf16.mxu1 %v1053_v0 }
  0x50   :  { %858 = vmatpush3.bf16.msra.mxu1 %v1177_v12 }
  0x51   :  { %883 = vmatprep.subr.bf16.mxu1 %v1053_v0 }
  0xeb   :  { %v1218_v16 = vpop.f32.mrb[0].mxu0 }
  0xec   :  { %v125_v17 = vpop.f32.mrb[1].mxu0  ;;  %v134_v41 = vadd.f32 %v1218_v16, %v1225_v20 }
  0xed   :  { %v1220_v18 = vpop.f32.mrb[2].mxu0  ;;  %v126_v21 = vadd.f32 %v1225_v20, %v125_v17 }
  0xee   :  { %v128_v19 = vpop.f32.mrb[3].mxu0  ;;  %v137_v49 = vadd.f32 %v1220_v18, %v1225_v20 }
  0xef   :  { %v129_v33 = vadd.f32 %v1225_v20, %v128_v19 }
  0xf3   :  { %v1246_v29 = vpop.f32.mrb[4].mxu0 }
  0xf4   :  { %v1248_v30 = vpop.f32.mrb[5].mxu0  ;;  %v150_v14 = vadd.f32 %v1246_v29, %v1225_v20 }
  0xf5   :  { %v1250_v31 = vpop.f32.mrb[6].mxu0  ;;  %v142_v57 = vadd.f32 %v1225_v20, %v1248_v30 }
  0xf6   :  { %v1252_v32 = vpop.f32.mrb[7].mxu0 }
 0x106   :  { %v254_v22 = vpop.f32.mrb[0].mxu1 }
 0x107   :  { %v260_v23 = vadd.f32 %v254_v22, %v126_v21  ;;  %v821_v24 = vpop.f32.mrb[1].mxu1 }
 0x108   :  { %v257_v25 = vpop.f32.mrb[2].mxu1  ;;  %v1007_v24 = vld [vmem:[#allocation2 + $0x28] sm:$0xff]  }
 0x109   :  { %1010 = vtanh.f32 %v260_v23  ;;  %v822_v26 = vpop.f32.mrb[3].mxu1  ;;  %v1006_v23 = vld [vmem:[#allocation2 + $0x20] sm:$0xff]   ;;  %v1008_v25 = vld [vmem:[#allocation2 + $0x30] sm:$0xff]  }
 0x10a   :  { %v1009_v26 = vld [vmem:[#allocation2 + $0x38] sm:$0xff]  }
 0x113   :  { %v1011_v27 = vpop.eup %1010 }
 0x114   :  { %v262_v28 = vpack.c.bf16 %v1011_v27, %v1011_v27  ;;  %v153_v27 = vadd.f32 %v1250_v31, %v1225_v20 }
 0x116   :  { %840 = vmatmul.mubr.bf16.vlgmr.msra.gmra.mrb[8].mxu0 %v262_v28 }
 0x117   :  { %864 = vmatpush3.bf16.msra.mxu0 %v1109_v1  ;;  %879 = vmatprep.mubr.msk.bf16.mxu0 %vm1054_vm0, %v1053_v0 }
 0x118   :  { %865 = vmatprep.subr.bf16.mxu0 %v1053_v0 }
 0x11b   :  { %866 = vmatpush3.bf16.msra.mxu0 %v1115_v2 }
 0x11c   :  { %867 = vmatprep.subr.bf16.mxu0 %v1053_v0 }
 0x11f   :  { %868 = vmatpush3.bf16.msra.mxu0 %v1121_v3 }
 0x120   :  { %869 = vmatprep.subr.bf16.mxu0 %v1053_v0 }
 0x123   :  { %870 = vmatpush3.bf16.msra.mxu0 %v1140_v8 }
 0x124   :  { %871 = vmatprep.subr.bf16.mxu0 %v1053_v0 }
 0x127   :  { %872 = vmatpush3.bf16.msra.mxu0 %v1147_v9 }
 0x128   :  { %873 = vmatprep.subr.bf16.mxu0 %v1053_v0 }
 0x12b   :  { %874 = vmatpush3.bf16.msra.mxu0 %v1159_v10 }
 0x12c   :  { %875 = vmatprep.subr.bf16.mxu0 %v1053_v0 }
 0x12f   :  { %876 = vmatpush3.bf16.msra.mxu0 %v1168_v11 }
 0x130   :  { %877 = vmatprep.subr.bf16.mxu0 %v1053_v0 }
 0x133   :  { %878 = vmatpush3.bf16.msra.mxu0 %v1177_v12 }
 0x134   :  { %903 = vmatprep.subr.bf16.mxu0 %v1053_v0 }
 0x1e9   :  { %v297_v34 = vpop.f32.mrb[8].mxu0 }
 0x1ea   :  { %v303_v35 = vadd.f32 %v297_v34, %v129_v33  ;;  %v841_v36 = vpop.f32.mrb[9].mxu0 }
 0x1eb   :  { %v300_v37 = vpop.f32.mrb[10].mxu0  ;;  %v698_v36 = vld [vmem:[%s1358_s5] ss:$0 sm:$0xff] }
 0x1ec   :  { %1012 = vtanh.f32 %v303_v35  ;;  %v842_v38 = vpop.f32.mrb[11].mxu0 }
 0x1f6   :  { %v1013_v39 = vpop.eup %1012 }
 0x1f7   :  { %v305_v40 = vpack.c.bf16 %v1013_v39, %v1013_v39 }
 0x1f9   :  { %860 = vmatmul.mubr.bf16.vlgmr.msra.gmra.mrb[4].mxu1 %v305_v40 }
 0x1fa   :  { %884 = vmatpush3.bf16.msra.mxu1 %v1109_v1  ;;  %899 = vmatprep.mubr.msk.bf16.mxu1 %vm1054_vm0, %v1053_v0 }
 0x1fb   :  { %885 = vmatprep.subr.bf16.mxu1 %v1053_v0 }
 0x1fe   :  { %886 = vmatpush3.bf16.msra.mxu1 %v1115_v2 }
 0x1ff   :  { %887 = vmatprep.subr.bf16.mxu1 %v1053_v0 }
 0x202   :  { %888 = vmatpush3.bf16.msra.mxu1 %v1121_v3 }
 0x203   :  { %889 = vmatprep.subr.bf16.mxu1 %v1053_v0 }
 0x206   :  { %890 = vmatpush3.bf16.msra.mxu1 %v1140_v8 }
 0x207   :  { %891 = vmatprep.subr.bf16.mxu1 %v1053_v0 }
 0x20a   :  { %892 = vmatpush3.bf16.msra.mxu1 %v1147_v9 }
 0x20b   :  { %893 = vmatprep.subr.bf16.mxu1 %v1053_v0 }
 0x20e   :  { %894 = vmatpush3.bf16.msra.mxu1 %v1159_v10 }
 0x20f   :  { %895 = vmatprep.subr.bf16.mxu1 %v1053_v0 }
 0x212   :  { %896 = vmatpush3.bf16.msra.mxu1 %v1168_v11 }
 0x213   :  { %897 = vmatprep.subr.bf16.mxu1 %v1053_v0 }
 0x216   :  { %898 = vmatpush3.bf16.msra.mxu1 %v1177_v12 }
 0x217   :  { %923 = vmatprep.subr.bf16.mxu1 %v1053_v0 }
 0x2cc   :  { %v340_v42 = vpop.f32.mrb[4].mxu1 }
 0x2cd   :  { %v346_v43 = vadd.f32 %v340_v42, %v134_v41  ;;  %v861_v44 = vpop.f32.mrb[5].mxu1 }
 0x2ce   :  { %v343_v45 = vpop.f32.mrb[6].mxu1 }
 0x2cf   :  { %1014 = vtanh.f32 %v346_v43  ;;  %v862_v46 = vpop.f32.mrb[7].mxu1 }
 0x2d9   :  { %v1015_v47 = vpop.eup %1014 }
 0x2da   :  { %v348_v48 = vpack.c.bf16 %v1015_v47, %v1015_v47 }
 0x2dc   :  { %880 = vmatmul.mubr.bf16.vlgmr.msra.gmra.mrb[12].mxu0 %v348_v48 }
 0x2dd   :  { %904 = vmatpush3.bf16.msra.mxu0 %v1109_v1  ;;  %919 = vmatprep.mubr.msk.bf16.mxu0 %vm1054_vm0, %v1053_v0 }
 0x2de   :  { %905 = vmatprep.subr.bf16.mxu0 %v1053_v0 }
 0x2e1   :  { %906 = vmatpush3.bf16.msra.mxu0 %v1115_v2 }
 0x2e2   :  { %907 = vmatprep.subr.bf16.mxu0 %v1053_v0 }
 0x2e5   :  { %908 = vmatpush3.bf16.msra.mxu0 %v1121_v3 }
 0x2e6   :  { %909 = vmatprep.subr.bf16.mxu0 %v1053_v0 }
 0x2e9   :  { %910 = vmatpush3.bf16.msra.mxu0 %v1140_v8 }
 0x2ea   :  { %911 = vmatprep.subr.bf16.mxu0 %v1053_v0 }
 0x2ed   :  { %912 = vmatpush3.bf16.msra.mxu0 %v1147_v9 }
 0x2ee   :  { %913 = vmatprep.subr.bf16.mxu0 %v1053_v0 }
 0x2f1   :  { %914 = vmatpush3.bf16.msra.mxu0 %v1159_v10 }
 0x2f2   :  { %915 = vmatprep.subr.bf16.mxu0 %v1053_v0 }
 0x2f5   :  { %916 = vmatpush3.bf16.msra.mxu0 %v1168_v11 }
 0x2f6   :  { %917 = vmatprep.subr.bf16.mxu0 %v1053_v0 }
 0x2f9   :  { %918 = vmatpush3.bf16.msra.mxu0 %v1177_v12 }
 0x2fa   :  { %943 = vmatprep.subr.bf16.mxu0 %v1053_v0 }
 0x3af   :  { %v383_v50 = vpop.f32.mrb[12].mxu0 }
 0x3b0   :  { %v389_v51 = vadd.f32 %v383_v50, %v137_v49  ;;  %v881_v52 = vpop.f32.mrb[13].mxu0 }
 0x3b1   :  { %v386_v53 = vpop.f32.mrb[14].mxu0 }
 0x3b2   :  { %1016 = vtanh.f32 %v389_v51  ;;  %v882_v54 = vpop.f32.mrb[15].mxu0 }
 0x3bc   :  { %v1017_v55 = vpop.eup %1016 }
 0x3bd   :  { %v391_v56 = vpack.c.bf16 %v1017_v55, %v1017_v55 }
 0x3bf   :  { %900 = vmatmul.mubr.bf16.vlgmr.msra.gmra.mrb[8].mxu1 %v391_v56 }
 0x3c0   :  { %924 = vmatpush3.bf16.msra.mxu1 %v1109_v1  ;;  %939 = vmatprep.mubr.msk.bf16.mxu1 %vm1054_vm0, %v1053_v0 }
 0x3c1   :  { %925 = vmatprep.subr.bf16.mxu1 %v1053_v0 }
 0x3c4   :  { %926 = vmatpush3.bf16.msra.mxu1 %v1115_v2 }
 0x3c5   :  { %927 = vmatprep.subr.bf16.mxu1 %v1053_v0 }
 0x3c8   :  { %928 = vmatpush3.bf16.msra.mxu1 %v1121_v3 }
 0x3c9   :  { %929 = vmatprep.subr.bf16.mxu1 %v1053_v0 }
 0x3cc   :  { %930 = vmatpush3.bf16.msra.mxu1 %v1140_v8 }
 0x3cd   :  { %931 = vmatprep.subr.bf16.mxu1 %v1053_v0 }
 0x3d0   :  { %932 = vmatpush3.bf16.msra.mxu1 %v1147_v9 }
 0x3d1   :  { %933 = vmatprep.subr.bf16.mxu1 %v1053_v0 }
 0x3d4   :  { %934 = vmatpush3.bf16.msra.mxu1 %v1159_v10 }
 0x3d5   :  { %935 = vmatprep.subr.bf16.mxu1 %v1053_v0 }
 0x3d8   :  { %936 = vmatpush3.bf16.msra.mxu1 %v1168_v11 }
 0x3d9   :  { %937 = vmatprep.subr.bf16.mxu1 %v1053_v0 }
 0x3dc   :  { %938 = vmatpush3.bf16.msra.mxu1 %v1177_v12 }
 0x3dd   :  { %963 = vmatprep.subr.bf16.mxu1 %v1053_v0 }
 0x492   :  { %v426_v58 = vpop.f32.mrb[8].mxu1 }
 0x493   :  { %v432_v59 = vadd.f32 %v426_v58, %v142_v57  ;;  %v901_v60 = vpop.f32.mrb[9].mxu1 }
 0x494   :  { %v429_v61 = vpop.f32.mrb[10].mxu1 }
 0x495   :  { %1018 = vtanh.f32 %v432_v59  ;;  %v902_v62 = vpop.f32.mrb[11].mxu1 }
 0x49f   :  { %v1019_v63 = vpop.eup %1018 }
 0x4a0   :  { %v434_v4 = vpack.c.bf16 %v1019_v63, %v1019_v63 }
 0x4a2   :  { %920 = vmatmul.mubr.bf16.vlgmr.msra.gmra.mrb[16].mxu0 %v434_v4 }
 0x4a3   :  { %944 = vmatpush3.bf16.msra.mxu0 %v1109_v1  ;;  %959 = vmatprep.mubr.msk.bf16.mxu0 %vm1054_vm0, %v1053_v0  ;;  %v145_v1 = vadd.f32 %v1225_v20, %v1252_v32 }
 0x4a4   :  { %945 = vmatprep.subr.bf16.mxu0 %v1053_v0 }
 0x4a7   :  { %946 = vmatpush3.bf16.msra.mxu0 %v1115_v2 }
 0x4a8   :  { %947 = vmatprep.subr.bf16.mxu0 %v1053_v0 }
 0x4ab   :  { %948 = vmatpush3.bf16.msra.mxu0 %v1121_v3 }
 0x4ac   :  { %949 = vmatprep.subr.bf16.mxu0 %v1053_v0 }
 0x4af   :  { %950 = vmatpush3.bf16.msra.mxu0 %v1140_v8 }
 0x4b0   :  { %951 = vmatprep.subr.bf16.mxu0 %v1053_v0 }
 0x4b3   :  { %952 = vmatpush3.bf16.msra.mxu0 %v1147_v9 }
 0x4b4   :  { %953 = vmatprep.subr.bf16.mxu0 %v1053_v0 }
 0x4b7   :  { %954 = vmatpush3.bf16.msra.mxu0 %v1159_v10  ;;  %v1002_v10 = vld [vmem:[#allocation2] sm:$0xff]  }
 0x4b8   :  { %955 = vmatprep.subr.bf16.mxu0 %v1053_v0 }
 0x4bb   :  { %956 = vmatpush3.bf16.msra.mxu0 %v1168_v11  ;;  %v1003_v11 = vld [vmem:[#allocation2 + $0x8] sm:$0xff]  }
 0x4bc   :  { %957 = vmatprep.subr.bf16.mxu0 %v1053_v0 }
 0x4bf   :  { %958 = vmatpush3.bf16.msra.mxu0 %v1177_v12  ;;  %v1004_v12 = vld [vmem:[#allocation2 + $0x10] sm:$0xff]  }
 0x575   :  { %v469_v2 = vpop.f32.mrb[16].mxu0 }
 0x576   :  { %v475_v3 = vadd.f32 %v469_v2, %v145_v1  ;;  %v921_v5 = vpop.f32.mrb[17].mxu0 }
 0x577   :  { %v472_v6 = vpop.f32.mrb[18].mxu0 }
 0x578   :  { %1020 = vtanh.f32 %v475_v3  ;;  %v922_v7 = vpop.f32.mrb[19].mxu0 }
 0x582   :  { %v1021_v8 = vpop.eup %1020 }
 0x583   :  { %v477_v9 = vpack.c.bf16 %v1021_v8, %v1021_v8 }
 0x585   :  { %940 = vmatmul.mubr.bf16.vlgmr.msra.gmra.mrb[12].mxu1 %v477_v9 }
 0x586   :  { %979 = vmatprep.mubr.msk.bf16.mxu1 %vm1054_vm0, %v1053_v0  ;;  %964 = vmatpush3.bf16.msra.mxu1 %v1002_v10 }
 0x587   :  { %965 = vmatprep.subr.bf16.mxu1 %v1053_v0 }
 0x58a   :  { %966 = vmatpush3.bf16.msra.mxu1 %v1003_v11 }
 0x58b   :  { %967 = vmatprep.subr.bf16.mxu1 %v1053_v0 }
 0x58e   :  { %968 = vmatpush3.bf16.msra.mxu1 %v1004_v12 }
 0x58f   :  { %969 = vmatprep.subr.bf16.mxu1 %v1053_v0 }
 0x592   :  { %970 = vmatpush3.bf16.msra.mxu1 %v1005_v13 }
 0x593   :  { %971 = vmatprep.subr.bf16.mxu1 %v1053_v0 }
 0x596   :  { %972 = vmatpush3.bf16.msra.mxu1 %v1006_v23 }
 0x597   :  { %973 = vmatprep.subr.bf16.mxu1 %v1053_v0 }
 0x59a   :  { %974 = vmatpush3.bf16.msra.mxu1 %v1007_v24 }
 0x59b   :  { %975 = vmatprep.subr.bf16.mxu1 %v1053_v0 }
 0x59e   :  { %976 = vmatpush3.bf16.msra.mxu1 %v1008_v25 }
 0x59f   :  { %977 = vmatprep.subr.bf16.mxu1 %v1053_v0 }
 0x5a2   :  { %978 = vmatpush3.bf16.msra.mxu1 %v1009_v26 }
 0x658   :  { %v512_v15 = vpop.f32.mrb[12].mxu1 }
 0x659   :  { %v518_v16 = vadd.f32 %v512_v15, %v150_v14  ;;  %v941_v17 = vpop.f32.mrb[13].mxu1 }
 0x65a   :  { %v515_v18 = vpop.f32.mrb[14].mxu1 }
 0x65b   :  { %1022 = vtanh.f32 %v518_v16  ;;  %v942_v19 = vpop.f32.mrb[15].mxu1 }
 0x665   :  { %v1023_v21 = vpop.eup %1022 }
 0x666   :  { %v520_v22 = vpack.c.bf16 %v1023_v21, %v1023_v21 }
 0x668   :  { %960 = vmatmul.mubr.bf16.vlgmr.msra.gmra.mrb[20].mxu0 %v520_v22 }
 0x73b   :  { %v555_v28 = vpop.f32.mrb[20].mxu0 }
 0x73c   :  { %v561_v29 = vadd.f32 %v555_v28, %v153_v27  ;;  %v961_v30 = vpop.f32.mrb[21].mxu0 }
 0x73d   :  { %v558_v32 = vpop.f32.mrb[22].mxu0 }
 0x73e   :  { %1024 = vtanh.f32 %v561_v29  ;;  %v962_v33 = vpop.f32.mrb[23].mxu0 }
 0x748   :  { %v1025_v34 = vpop.eup %1024 }
 0x749   :  { %v563_v35 = vpack.c.bf16 %v1025_v34, %v1025_v34 }
 0x74b   :  { %980 = vmatmul.mubr.bf16.vlgmr.msra.gmra.mrb[16].mxu1 %v563_v35 }
 0x81e   :  { %v669_v37 = vpop.f32.mrb[16].mxu1 }
 0x81f   :  { %v670_v0 = vadd.f32 %v698_v36, %v669_v37  ;;  %v981_v38 = vpop.f32.mrb[17].mxu1 }
 0x820   :  { %v672_v39 = vpop.f32.mrb[18].mxu1 }
 0x821   :  { %675 = vst [vmem:[%s1359_s6] sm:$0xff] %v670_v0  ;;  %v982_v20 = vpop.f32.mrb[19].mxu1 }
 0x822   :  { %680 = vsyncpa [#allocation3], 1 }

</bundles_post_ra>
